<compile_context>
chip_gen: v7x
topology: tpu7x:2x2x1
jax: 0.10.0
libtpu: 0.0.40
codegen_flags: <defaults>
</compile_context>

<pallas_src>
import functools

import jax
import jax.numpy as jnp
from jax.experimental import pallas as pl
from jax.experimental.pallas import tpu as pltpu


def _round_up(x, m):
    return (x + m - 1) // m * m


def _multimodal_kernel(audio_ref, mel_ref,
                       wqk_ref, bqk_ref,
                       wc_ref, bc_ref,
                       out_ref):
    """One batch tile of the fused MultiModalAttention + classifier.

    audio_ref: (TB, D)      mel_ref: (TB, M)        (module requires D == M)
    wqk_ref:   (D + M, 2M)  block-diag [[Wq^T, 0], [0, Wk^T]]
    bqk_ref:   (1, 2M)      [bq | bk]
    wc_ref:    (D, C)       bc_ref:  (1, C)
    out_ref:   (TB, C)
    """
    m = mel_ref.shape[1]

    # Elementwise phase in f32 (safe on v5e's f32-only VPU/EUP); bf16 feature
    # inputs are supported — the cast here is the only place dtype matters.
    audio = audio_ref[...].astype(jnp.float32)   # (TB, D)
    mel = mel_ref[...].astype(jnp.float32)       # (TB, M)

    # Q = query(audio), K = key(mel) fused into a single MXU matmul against the
    # block-diagonal weight.  (The V projection in the PyTorch forward is dead
    # code — its result never reaches the output — so it is omitted entirely.)
    am = jnp.concatenate([audio, mel], axis=1)                       # (TB, D+M)
    qk = jnp.dot(am, wqk_ref[...],
                 preferred_element_type=jnp.float32) + bqk_ref[...]  # (TB, 2M)
    q = qk[:, :m]
    k = qk[:, m:]

    # attention_scores = softmax(Q * K, dim=1)  (elementwise product, row softmax)
    # Exact division: the denom is a (TB, 1) column, approx reciprocal buys nothing.
    s = q * k                                     # (TB, M)
    s = s - jnp.max(s, axis=1, keepdims=True)
    e = jnp.exp(s)
    attn = e / jnp.sum(e, axis=1, keepdims=True)

    # weighted fusion: attn * audio + (1 - attn) * mel == mel + attn * (audio - mel)
    fused = mel + attn * (audio - mel)            # (TB, D)

    # classifier — direct (TB, C) store (no lane padding, no external slice).
    logits = jnp.dot(fused, wc_ref[...],
                     preferred_element_type=jnp.float32) + bc_ref[...]
    out_ref[...] = logits.astype(out_ref.dtype)


def prepare_params(params):
    """One-time parameter preparation (do NOT redo this every forward call).

    nn.Linear stores weight as (out, in).  Builds the block-diagonal fused Q/K
    weight (D+M, 2M), the concatenated Q/K bias (1, 2M), and the transposed
    classifier weight (D, C).
    """
    wq = jnp.asarray(params["wq"])                  # (mel_dim, audio_dim)
    wk = jnp.asarray(params["wk"])                  # (mel_dim, mel_dim)
    wc = jnp.asarray(params["wc"])                  # (num_classes, d_model)
    bq = jnp.asarray(params["bq"]).reshape(1, -1)
    bk = jnp.asarray(params["bk"]).reshape(1, -1)
    bc = jnp.asarray(params["bc"]).reshape(1, -1)

    m, d = wq.shape
    assert wk.shape == (m, m), "key projection must be (mel_dim, mel_dim)"
    # The PyTorch forward broadcasts attention_scores (B, mel_dim) against
    # audio_features (B, audio_dim); that only works when the dims match.
    assert d == m, "MultiModalAttention requires audio_dim == mel_dim"

    wqk = jnp.zeros((d + m, 2 * m), jnp.float32)
    wqk = wqk.at[:d, :m].set(wq.T)                  # [[Wq^T, 0],
    wqk = wqk.at[d:, m:].set(wk.T)                  #  [0,  Wk^T]]
    bqk = jnp.concatenate([bq, bk], axis=1)         # (1, 2M)

    return {"wqk": wqk, "bqk": bqk, "wc_t": wc.T, "bc": bc}


@functools.partial(jax.jit, static_argnames=("batch_tile",))
def _forward_impl(audio_features, mel_features, prep, *, batch_tile):
    B, D = audio_features.shape
    M = mel_features.shape[1]
    C = prep["wc_t"].shape[1]

    # Single full-batch step for small/medium batches (per-step overhead is the
    # dominant cost at these feature dims); otherwise stream `batch_tile` rows
    # per step.  VMEM per tile is ~ tb*(D+M+C)*4B*2 — tiny even at tb=2048.
    if B <= batch_tile:
        tb = B
        b_pad = B
    else:
        tb = batch_tile                   # multiple of 8 by construction
        b_pad = _round_up(B, tb)

    audio_p, mel_p = audio_features, mel_features
    if b_pad != B:
        # Zero-pad the tail tile so no grid step touches uninitialized rows
        # (keeps exp() finite in the discarded rows, stores full-width).
        audio_p = jnp.pad(audio_features, ((0, b_pad - B), (0, 0)))
        mel_p = jnp.pad(mel_features, ((0, b_pad - B), (0, 0)))

    batch_map = lambda i: (i, 0)      # activations / output stream over the grid
    pinned_map = lambda i: (0, 0)     # weights stay VMEM-resident across tiles

    out = pl.pallas_call(
        _multimodal_kernel,
        out_shape=jax.ShapeDtypeStruct((b_pad, C), jnp.float32),
        grid=(b_pad // tb,),
        in_specs=[
            pl.BlockSpec((tb, D), batch_map),          # audio features
            pl.BlockSpec((tb, M), batch_map),          # mel features
            pl.BlockSpec((D + M, 2 * M), pinned_map),  # fused Q/K weight
            pl.BlockSpec((1, 2 * M), pinned_map),      # fused Q/K bias
            pl.BlockSpec((D, C), pinned_map),          # classifier weight
            pl.BlockSpec((1, C), pinned_map),          # classifier bias
        ],
        out_specs=pl.BlockSpec((tb, C), batch_map),
        compiler_params=pltpu.CompilerParams(
            dimension_semantics=("parallel",),          # megacore sharding on v7x
        ),
    )(audio_p, mel_p, prep["wqk"], prep["bqk"], prep["wc_t"], prep["bc"])

    if b_pad != B:
        out = out[:B]
    return out


def multimodal_forward(audio_features, mel_features, prep, *, batch_tile=1024):
    # v7x tip: pass batch_tile ≈ round_up(cdiv(B, 2), 8) so the parallel batch
    # axis keeps >= 2 grid steps for the two TensorCores.
    return _forward_impl(audio_features, mel_features, prep, batch_tile=batch_tile)


def _reference(audio, mel, params):
    """Pure-JAX reference mirroring the PyTorch forward."""
    q = audio @ params["wq"].T + params["bq"]
    k = mel @ params["wk"].T + params["bk"]
    s = q * k
    attn = jax.nn.softmax(s, axis=1)
    fused = attn * audio + (1.0 - attn) * mel
    return fused @ params["wc"].T + params["bc"]


def init_params(key, d_model=4, mel_dim=4, num_classes=4):
    """Deterministic parameter init (uniform +-1/sqrt(fan_in), like nn.Linear)."""
    ks = jax.random.split(key, 8)

    def lin(kw, kb, out_f, in_f):
        bound = 1.0 / jnp.sqrt(in_f)
        w = jax.random.uniform(kw, (out_f, in_f), jnp.float32, -bound, bound)
        b = jax.random.uniform(kb, (out_f,), jnp.float32, -bound, bound)
        return w, b

    wq, bq = lin(ks[0], ks[1], mel_dim, d_model)      # query: audio_dim -> mel_dim
    wk, bk = lin(ks[2], ks[3], mel_dim, mel_dim)      # key:   mel_dim   -> mel_dim
    wc, bc = lin(ks[6], ks[7], num_classes, d_model)  # classifier
    # (value-projection params exist in the PyTorch module but are dead code in
    #  the forward, so they are not created / passed to the kernel.)
    return {"wq": wq, "bq": bq, "wk": wk, "bk": bk, "wc": wc, "bc": bc}


if __name__ == "__main__":
    B, D_MODEL, MEL_DIM, NUM_CLASSES = 2, 4, 4, 4

    key = jax.random.PRNGKey(0)
    k_audio, k_mel, k_params, k_a2, k_m2 = jax.random.split(key, 5)

    # Pre-extracted features (AudioCNN / CNN6 backbones are unspecified upstream).
    audio_features = jax.random.normal(k_audio, (B, D_MODEL), jnp.float32)
    mel_features = jax.random.normal(k_mel, (B, MEL_DIM), jnp.float32)

    params = init_params(k_params, D_MODEL, MEL_DIM, NUM_CLASSES)
    prep = prepare_params(params)            # one-time weight fusion / transpose

    out = jax.block_until_ready(multimodal_forward(audio_features, mel_features, prep))
    ref = _reference(audio_features, mel_features, params)
    assert out.shape == (B, NUM_CLASSES)
    assert jnp.allclose(out, ref, atol=1e-4, rtol=1e-4)

    # Secondary check: multi-step grid + padded tail tile (B2 % batch_tile != 0).
    B2 = 2500
    audio2 = jax.random.normal(k_a2, (B2, D_MODEL), jnp.float32)
    mel2 = jax.random.normal(k_m2, (B2, MEL_DIM), jnp.float32)
    out2 = jax.block_until_ready(multimodal_forward(audio2, mel2, prep))
    ref2 = _reference(audio2, mel2, params)
    assert out2.shape == (B2, NUM_CLASSES)
    assert jnp.allclose(out2, ref2, atol=1e-4, rtol=1e-4)

    print("KERNEL_OK")
</pallas_src>

<mosaic_0001>
module attributes {stable_mosaic.version = 11 : i64} {
  func.func @_multimodal_kernel(%arg0: i32, %arg1: memref<2x4xf32, #tpu.memory_space<vmem>>, %arg2: memref<2x4xf32, #tpu.memory_space<vmem>>, %arg3: memref<8x8xf32, #tpu.memory_space<vmem>>, %arg4: memref<1x8xf32, #tpu.memory_space<vmem>>, %arg5: memref<4x4xf32, #tpu.memory_space<vmem>>, %arg6: memref<1x4xf32, #tpu.memory_space<vmem>>, %arg7: memref<2x4xf32, #tpu.memory_space<vmem>>) attributes {dimension_semantics = [#tpu.dimension_semantics<parallel>], iteration_bounds = array<i64: 1>, scalar_prefetch = 0 : i64, scratch_operands = 0 : i64, tpu.core_type = #tpu.core_type<tc>, window_params = [{transform_indices = @transform_0, window_bounds = array<i64: 2, 4>}, {transform_indices = @transform_1, window_bounds = array<i64: 2, 4>}, {pipeline_mode = #tpu.pipeline_mode<synchronous>, transform_indices = @transform_2, window_bounds = array<i64: 8, 8>}, {pipeline_mode = #tpu.pipeline_mode<synchronous>, transform_indices = @transform_3, window_bounds = array<i64: 1, 8>}, {pipeline_mode = #tpu.pipeline_mode<synchronous>, transform_indices = @transform_4, window_bounds = array<i64: 4, 4>}, {pipeline_mode = #tpu.pipeline_mode<synchronous>, transform_indices = @transform_5, window_bounds = array<i64: 1, 4>}, {transform_indices = @transform_6, window_bounds = array<i64: 2, 4>}]} {
    %c0 = arith.constant 0 : index
    %c0_0 = arith.constant 0 : index
    %0 = vector.load %arg1[%c0, %c0_0] : memref<2x4xf32, #tpu.memory_space<vmem>>, vector<2x4xf32>
    %c0_1 = arith.constant 0 : index
    %c0_2 = arith.constant 0 : index
    %1 = vector.load %arg2[%c0_1, %c0_2] : memref<2x4xf32, #tpu.memory_space<vmem>>, vector<2x4xf32>
    %2 = tpu.concatenate %0, %1 in 1 : vector<2x4xf32>, vector<2x4xf32> -> vector<2x8xf32>
    %c0_3 = arith.constant 0 : index
    %c0_4 = arith.constant 0 : index
    %3 = vector.load %arg3[%c0_3, %c0_4] : memref<8x8xf32, #tpu.memory_space<vmem>>, vector<8x8xf32>
    %cst = arith.constant dense<0.000000e+00> : vector<2x8xf32>
    %4 = tpu.matmul %2, %3, %cst {dimension_numbers = #tpu.dot_dimension_numbers<[1], [0], [0], [1], [0, 0, 1, 1], [], []>} : vector<2x8xf32>, vector<8x8xf32>, vector<2x8xf32> -> vector<2x8xf32>
    %c0_5 = arith.constant 0 : index
    %c0_6 = arith.constant 0 : index
    %5 = vector.load %arg4[%c0_5, %c0_6] : memref<1x8xf32, #tpu.memory_space<vmem>>, vector<1x8xf32>
    %6 = vector.broadcast %5 : vector<1x8xf32> to vector<2x8xf32>
    %7 = arith.addf %4, %6 : vector<2x8xf32>
    %8 = vector.extract_strided_slice %7 {offsets = [0, 0], sizes = [2, 4], strides = [1, 1]} : vector<2x8xf32> to vector<2x4xf32>
    %9 = vector.extract_strided_slice %7 {offsets = [0, 4], sizes = [2, 4], strides = [1, 1]} : vector<2x8xf32> to vector<2x4xf32>
    %10 = arith.mulf %8, %9 : vector<2x4xf32>
    %cst_7 = arith.constant dense<0xFF800000> : vector<2xf32>
    %11 = vector.multi_reduction <maximumf>, %10, %cst_7 [1] : vector<2x4xf32> to vector<2xf32>
    %12 = vector.shape_cast %11 : vector<2xf32> to vector<2x1xf32>
    %13 = vector.broadcast %12 : vector<2x1xf32> to vector<2x4xf32>
    %14 = arith.subf %10, %13 : vector<2x4xf32>
    %15 = math.exp %14 : vector<2x4xf32>
    %cst_8 = arith.constant dense<0.000000e+00> : vector<2xf32>
    %16 = vector.multi_reduction <add>, %15, %cst_8 [1] : vector<2x4xf32> to vector<2xf32>
    %17 = vector.shape_cast %16 : vector<2xf32> to vector<2x1xf32>
    %18 = vector.broadcast %17 : vector<2x1xf32> to vector<2x4xf32>
    %19 = arith.divf %15, %18 : vector<2x4xf32>
    %20 = arith.subf %0, %1 : vector<2x4xf32>
    %21 = arith.mulf %19, %20 : vector<2x4xf32>
    %22 = arith.addf %1, %21 : vector<2x4xf32>
    %c0_9 = arith.constant 0 : index
    %c0_10 = arith.constant 0 : index
    %23 = vector.load %arg5[%c0_9, %c0_10] : memref<4x4xf32, #tpu.memory_space<vmem>>, vector<4x4xf32>
    %cst_11 = arith.constant dense<0.000000e+00> : vector<2x4xf32>
    %24 = tpu.matmul %22, %23, %cst_11 {dimension_numbers = #tpu.dot_dimension_numbers<[1], [0], [0], [1], [0, 0, 1, 1], [], []>} : vector<2x4xf32>, vector<4x4xf32>, vector<2x4xf32> -> vector<2x4xf32>
    %c0_12 = arith.constant 0 : index
    %c0_13 = arith.constant 0 : index
    %25 = vector.load %arg6[%c0_12, %c0_13] : memref<1x4xf32, #tpu.memory_space<vmem>>, vector<1x4xf32>
    %26 = vector.broadcast %25 : vector<1x4xf32> to vector<2x4xf32>
    %27 = arith.addf %24, %26 : vector<2x4xf32>
    %c0_14 = arith.constant 0 : index
    %c0_15 = arith.constant 0 : index
    %28 = vector.load %arg7[%c0_14, %c0_15] : memref<2x4xf32, #tpu.memory_space<vmem>>, vector<2x4xf32>
    tpu.vector_store %arg7[%c0_14, %c0_15], %27 {strides = array<i32>} : memref<2x4xf32, #tpu.memory_space<vmem>>, vector<2x4xf32>,
    return
  }
  func.func @transform_0(%arg0: i32) -> (i32, i32) {
    %c0_i32 = arith.constant 0 : i32
    %c0_i32_0 = arith.constant 0 : i32
    return %arg0, %c0_i32 : i32, i32
  }
  func.func @transform_1(%arg0: i32) -> (i32, i32) {
    %c0_i32 = arith.constant 0 : i32
    %c0_i32_0 = arith.constant 0 : i32
    return %arg0, %c0_i32 : i32, i32
  }
  func.func @transform_2(%arg0: i32) -> (i32, i32) {
    %c0_i32 = arith.constant 0 : i32
    %c0_i32_0 = arith.constant 0 : i32
    %c0_i32_1 = arith.constant 0 : i32
    return %c0_i32, %c0_i32_0 : i32, i32
  }
  func.func @transform_3(%arg0: i32) -> (i32, i32) {
    %c0_i32 = arith.constant 0 : i32
    %c0_i32_0 = arith.constant 0 : i32
    %c0_i32_1 = arith.constant 0 : i32
    return %c0_i32, %c0_i32_0 : i32, i32
  }
  func.func @transform_4(%arg0: i32) -> (i32, i32) {
    %c0_i32 = arith.constant 0 : i32
    %c0_i32_0 = arith.constant 0 : i32
    %c0_i32_1 = arith.constant 0 : i32
    return %c0_i32, %c0_i32_0 : i32, i32
  }
  func.func @transform_5(%arg0: i32) -> (i32, i32) {
    %c0_i32 = arith.constant 0 : i32
    %c0_i32_0 = arith.constant 0 : i32
    %c0_i32_1 = arith.constant 0 : i32
    return %c0_i32, %c0_i32_0 : i32, i32
  }
  func.func @transform_6(%arg0: i32) -> (i32, i32) {
    %c0_i32 = arith.constant 0 : i32
    %c0_i32_0 = arith.constant 0 : i32
    return %arg0, %c0_i32 : i32, i32
  }
}

</mosaic_0001>

<bundles_post_ra>
// kernel: _forward_impl.1
= control target key start
LH: loop header
LB: loop body
LE: loop exit
PB: predicated region body
PF: predicated region fallthrough
CT: control target
= control target key end

     0   :  { %11 = vsyncpa [#allocation3], 0  ;;  %s457_s0 = inlined_call_operand.hbm [shape: f32[2,4], index: 0, kind: input, shape index: {}]   ;;  %s458_s1 = inlined_call_operand.vmem [shape: f32[2,4], index: 1, kind: input, shape index: {}]   ;;  %s459_s2 = inlined_call_operand.vmem [shape: f32[8,8], index: 2, kind: input, shape index: {}]   ;;  %s460_s3 = inlined_call_operand.vmem [shape: f32[1,8], index: 3, kind: input, shape index: {}]   ;;  %s461_s4 = inlined_call_operand.vmem [shape: f32[4,4], index: 4, kind: input, shape index: {}]   ;;  %s462_s5 = inlined_call_operand.hbm [shape: f32[1,4], index: 5, kind: input, shape index: {}]   ;;  %s463_s6 = inlined_call_operand.hbm [shape: f32[2,4], index: 6, kind: output, shape index: {}]  }
   0x1   :  { %12 = vsyncpa [#allocation6], 0 }
   0x2   :  { %13 = vsyncpa [#allocation4], 0  ;;  %s362_s21 = smov [#allocation2]   ;;  %s363_s23 = smov [#allocation5]  }
   0x3   :  { %s20_s22 = sshll.u32 %s362_s21, 4  ;;  %s38_s24 = sshll.u32 %s363_s23, 4  ;;  %s21_s22 = int_to_ptr.vmem [resolvable:$true] %s20_s22  ;;  %s39_s24 = int_to_ptr.vmem [resolvable:$true] %s38_s24 }
   0x4   :  { %s290_s27 = scalar_lea.hbm %s457_s0, 32 }
   0x5   :  { %p291_p0 = scmp.ne.s32.totalorder %s457_s0, %s290_s27  ;;  %p294_p1 = scmp.lt.u32.totalorder %s290_s27, %s457_s0 }
   0x7   :  { %p296_p2 = pnand %p294_p1, %p291_p0 }
   0x9   :  { %299 = shalt.err (!%p296_p2)
}
   0xa   :  { %s300_s8 = scalar_lea.vmem %s21_s22, 32  ;;  %p305_p4 = scmp.lt.s32.totalorder %s21_s22, %s21_s22 }
   0xb   :  { %p301_p3 = scmp.ne.s32.totalorder %s21_s22, %s300_s8  ;;  %p306_p5 = scmp.lt.s32.totalorder %s300_s8, %s300_s8 }
   0xd   :  { %p307_p6 = por %p306_p5, %p305_p4 }
   0xf   :  { %p308_p7 = pnand %p307_p6, %p301_p3 }
  0x11   :  { %311 = shalt.err (!%p308_p7)
}
  0x12   :  { %23 = dma.hbm_to_vmem [thread:$0]  %s457_s0, 32, %s21_s22, [#allocation3]  }
  0x13   :  { %s312_s13 = scalar_lea.hbm %s462_s5, 16 }
  0x14   :  { %p313_p8 = scmp.ne.s32.totalorder %s462_s5, %s312_s13  ;;  %p316_p9 = scmp.lt.u32.totalorder %s312_s13, %s462_s5 }
  0x16   :  { %p318_p10 = pnand %p316_p9, %p313_p8 }
  0x18   :  { %321 = shalt.err (!%p318_p10)
}
  0x19   :  { %s322_s18 = scalar_lea.vmem %s39_s24, 16  ;;  %s326_s19 = scalar_lea.vmem %s39_s24, 32 }
  0x1a   :  { %p323_p11 = scmp.ne.s32.totalorder %s39_s24, %s322_s18  ;;  %p327_p12 = scmp.lt.s32.totalorder %s39_s24, %s39_s24 }
  0x1b   :  { %p328_p13 = scmp.lt.s32.totalorder %s326_s19, %s322_s18 }
  0x1d   :  { %p329_p0 = por %p328_p13, %p327_p12 }
  0x1f   :  { %p330_p1 = pnand %p329_p0, %p323_p11 }
  0x21   :  { %333 = shalt.err (!%p330_p1)
}
  0x22   :  { %41 = dma.hbm_to_vmem [thread:$0]  %s462_s5, 16, %s39_s24, [#allocation6]  }
  0x23   :  { %356 = dma.done.wait [#allocation3], 32  }
  0x24   :  { %357 = vsyncadd [#allocation3], 4294967264 }
  0x25   :  { %358 = dma.done.wait [#allocation6], 16  }
  0x26   :  { %359 = vsyncadd [#allocation6], 4294967280  ;;  %v364_v0 = vmov 0.0   ;;  %vm365_vm0 = vmmov 0   ;;  %v49_v1 = vld [vmem:[%s458_s1] sm:$0x3] }
  0x27   :  { %269 = vmatprep.subr.mxu0 %v364_v0  ;;  %271 = vmatprep.mubr.msk.f32.mxu0 %vm365_vm0, %v364_v0  ;;  %v56_v2 = vld [vmem:[%s459_s2] sm:$0xff]  ;;  %s366_s26 = smov 4   ;;  %v48_v3 = vld [vmem:[#allocation2] sm:$0x3]  ;;  %vm54_vm1 = vcmask 31744   ;;  %vm64_vm2 = vcmask 64512  }
  0x28   :  { %274 = vmatprep.subr.mxu1 %v364_v0  ;;  %276 = vmatprep.mubr.msk.f32.mxu1 %vm365_vm0, %v364_v0  ;;  %v260_v6 = vld [vmem:[%s460_s3] ss:$0 sm:$0xff]  ;;  %s367_s1 = smov 124   ;;  %vm143_vm3 = vcmask 25600   ;;  %vm169_vm4 = vcmask 1043456   ;;  %v155_v20 = vsub.f32 %v48_v3, %v49_v1  ;;  %s368_s27 = smov [#allocation7]  }
  0x29   :  { %51 = vrot.lane.b32.xlu0 %v49_v1, %s366_s26  ;;  %270 = vmatpush3.msra.mxu0 %v56_v2  ;;  %v158_v18 = vld [vmem:[%s461_s4] sm:$0xf]  ;;  %v262_v25 = vld [vmem:[#allocation5] ss:$0 sm:$0xff]  ;;  %s250_s28 = sshll.u32 %s368_s27, 4  ;;  %s251_s28 = int_to_ptr.vmem [resolvable:$true] %s250_s28 }
  0x2a   :  { %275 = vmatpush3.msk.msra.mxu1 %vm169_vm4, %v158_v18  ;;  %s334_s4 = scalar_lea.vmem %s251_s28, 32  ;;  %p339_p3 = scmp.lt.s32.totalorder %s251_s28, %s251_s28 }
  0x2b   :  { %p335_p2 = scmp.ne.s32.totalorder %s251_s28, %s334_s4  ;;  %p340_p4 = scmp.lt.s32.totalorder %s334_s4, %s334_s4 }
  0x2d   :  { %p341_p5 = por %p340_p4, %p339_p3 }
  0x2f   :  { %p342_p6 = pnand %p341_p5, %p335_p2 }
  0x9b   :  { %v52_v4 = vpop.permute.xlu0 %51 }
  0x9c   :  { %v55_v5 = vsel %vm54_vm1, %v48_v3, %v52_v4 }
  0x9d   :  { %272 = vmatmul.mubr.msk.f32.vlgmr.msra.gmra.mrb[0].mxu0 %vm64_vm2, %v55_v5 }
 0x170   :  { %v134_v7 = vpop.f32.mrb[0].mxu0 }
 0x171   :  { %v135_v8 = vadd.f32 %v260_v6, %v134_v7  ;;  %v273_v9 = vpop.f32.mrb[1].mxu0 }
 0x173   :  { %139 = vrot.lane.b32.xlu0 %v135_v8, %s367_s1 }
 0x1e5   :  { %v140_v10 = vpop.permute.xlu0 %139 }
 0x1e6   :  { %v142_v11 = vmul.f32 %v140_v10, %v135_v8 }
 0x1e8   :  { %v144_v12 = vsel %vm143_vm3, %v142_v11, -inf }
 0x1e9   :  { %145 = vmax.xlane.f32.xlu1 %v144_v12 }
 0x276   :  { %v146_v13 = vpop.xlane.xlu1 %145 }
 0x277   :  { %v147_v14 = vsub.f32 %v142_v11, %v146_v13 }
 0x279   :  { %v148_v15 = vmul.f32 1.442695, %v147_v14 }
 0x27b   :  { %286 = vpow2.f32 %v148_v15 }
 0x285   :  { %v287_v16 = vpop.eup %286 }
 0x286   :  { %v150_v17 = vsel %vm143_vm3, %v287_v16, 0.0 }
 0x287   :  { %151 = vadd.xlane.f32.xlu1 %v150_v17 }
 0x314   :  { %v152_v19 = vpop.xlane.xlu1 %151 }
 0x315   :  { %288 = vrcp.f32 %v152_v19 }
 0x31f   :  { %v289_v21 = vpop.eup %288 }
 0x320   :  { %v154_v22 = vmul.f32 %v289_v21, %v287_v16 }
 0x322   :  { %v156_v23 = vmul.f32 %v155_v20, %v154_v22 }
 0x324   :  { %v157_v24 = vadd.f32 %v156_v23, %v49_v1 }
 0x326   :  { %277 = vmatmul.mubr.msk.f32.vlgmr.msra.gmra.mrb[0].mxu1 %vm54_vm1, %v157_v24 }
 0x3f9   :  { %v239_v26 = vpop.f32.mrb[0].mxu1 }
 0x3fa   :  { %v240_v27 = vadd.f32 %v262_v25, %v239_v26  ;;  %v278_v28 = vpop.f32.mrb[1].mxu1 }
 0x3fc   :  { %243 = vst.msk [vmem:[#allocation7] sm:$0x3] %vm143_vm3, %v240_v27 }
 0x3fd   :  { %345 = shalt.err (!%p342_p6)
}
 0x3fe   :  { %s346_s7 = scalar_lea.hbm %s463_s6, 32 }
 0x3ff   :  { %p347_p7 = scmp.ne.s32.totalorder %s463_s6, %s346_s7  ;;  %p350_p8 = scmp.lt.u32.totalorder %s346_s7, %s463_s6 }
 0x401   :  { %p352_p9 = pnand %p350_p8, %p347_p7 }
 0x403   :  { %355 = shalt.err (!%p352_p9)
}
 0x404   :  { %253 = dma.vmem_to_hbm [thread:$0]  %s251_s28, 32, %s463_s6, [#allocation4]  }
 0x405   :  { %360 = dma.done.wait [#allocation4], 32  }
 0x406   :  { %361 = vsyncadd [#allocation4], 4294967264 }
 0x407   :  { %257 = vsyncpa [#allocation3], 1 }
 0x408   :  { %258 = vsyncpa [#allocation6], 1 }
 0x409   :  { %259 = vsyncpa [#allocation4], 1 }

</bundles_post_ra>
